<compile_context>
chip_gen: v6e
topology: v6e:2x2x1
jax: 0.10.0
libtpu: 0.0.40
codegen_flags: <defaults>
</compile_context>

<pallas_src>
import functools

import jax
import jax.numpy as jnp
from jax.experimental import pallas as pl
from jax.experimental.pallas import tpu as pltpu

LN_EPS = 1e-5  # nn.LayerNorm default


def _expand_norm_t_kernel(x_ref, w_ref, g_ref, b_ref, o_ref):
    # x_ref: (1, tm, C)    w_ref: (C, Cout)    g_ref/b_ref: (1, Cout)  [f32]
    # o_ref: (1, Cout, tm)
    # Matmul: bf16 operands on the MXU, f32 accumulation.
    y = jnp.dot(x_ref[0], w_ref[...], preferred_element_type=jnp.float32)  # (tm, Cout)
    inv_n = 1.0 / y.shape[-1]
    # Single-pass mean / variance (one pair of cross-lane reductions).
    s1 = jnp.sum(y, axis=-1, keepdims=True) * inv_n           # mean,  (tm, 1)
    s2 = jnp.sum(y * y, axis=-1, keepdims=True) * inv_n       # E[y^2],(tm, 1)
    var = s2 - s1 * s1
    scale = jax.lax.rsqrt(var + LN_EPS) * g_ref[...]          # gamma folded into rstd
    out = (y - s1) * scale + b_ref[...]                       # (tm, Cout), f32 LN math
    # Transpose in-kernel so the store is channel-first and lane-dense (tokens
    # on the lane axis); removes the separate XLA transpose pass entirely.
    o_ref[0] = out.T.astype(o_ref.dtype)                      # (Cout, tm)


def _pick_tm(L, target=1024):
    """Largest multiple of 128 that divides L and is <= target; else L itself.

    A full-extent (tm == L) block is always legal w.r.t. the (8, 128) block
    constraint, so there is never a tiny-tile fallback.
    """
    best = None
    t = 128
    while t <= min(L, target):
        if L % t == 0:
            best = t
        t += 128
    return best if best is not None else L


def expand_norm_transposed(x, w, gamma, beta, *, compute_dtype=jnp.bfloat16,
                           out_dtype=None, tm_target=1024):
    """Fused Linear(no bias) + LayerNorm + channel-first transpose.

    x: (B, L, C), w: (C, Cout), gamma/beta: (Cout,)
    Returns y: (B, Cout, L) with y[b, :, l] = LN(x[b, l] @ w) * gamma + beta.
    """
    B, L, C = x.shape
    Cout = w.shape[1]
    if out_dtype is None:
        out_dtype = x.dtype
    tm = _pick_tm(L, tm_target)
    n_j = L // tm

    # bf16 HBM operands feeding the MXU (LN math stays f32 inside the kernel).
    xc = x.astype(compute_dtype)
    wc = w.astype(compute_dtype)
    g2 = gamma.reshape(1, Cout).astype(jnp.float32)
    b2 = beta.reshape(1, Cout).astype(jnp.float32)

    # Explicit VMEM budget (double-buffered x/out tiles + resident weight +
    # f32 intermediates), capped so it is valid on v7x's 64 MiB VMEM too.
    in_b = jnp.dtype(compute_dtype).itemsize
    out_b = jnp.dtype(out_dtype).itemsize
    est = (2 * tm * C * in_b
           + 2 * C * Cout * in_b
           + 2 * Cout * tm * out_b
           + 8 * tm * Cout * 4
           + (1 << 20))
    vmem_limit = int(min(max(est, 32 << 20), 64 << 20))

    return pl.pallas_call(
        _expand_norm_t_kernel,
        out_shape=jax.ShapeDtypeStruct((B, Cout, L), out_dtype),
        grid_spec=pltpu.PrefetchScalarGridSpec(
            num_scalar_prefetch=0,
            grid=(B, n_j),
            in_specs=[
                pl.BlockSpec((1, tm, C), lambda b, j: (b, j, 0)),   # token tile
                pl.BlockSpec((C, Cout), lambda b, j: (0, 0)),       # weight (resident)
                pl.BlockSpec((1, Cout), lambda b, j: (0, 0)),       # LN gamma
                pl.BlockSpec((1, Cout), lambda b, j: (0, 0)),       # LN beta
            ],
            out_specs=pl.BlockSpec((1, Cout, tm), lambda b, j: (b, 0, j)),
        ),
        compiler_params=pltpu.CompilerParams(
            dimension_semantics=("parallel", "parallel"),
            vmem_limit_bytes=vmem_limit,
        ),
    )(xc, wc, g2, b2)


def patch_expand_forward(x, w_linear, gamma, beta, input_resolution,
                         upsample_scale=2, *, compute_dtype=jnp.bfloat16,
                         out_dtype=None):
    """Full PatchExpand forward. x: (B, L=H*W, dim) -> (B, dim//2, H*s, W*s) NCHW."""
    H, W = input_resolution
    B, L, dim = x.shape
    assert L == H * W, (L, H, W)
    Cout = w_linear.shape[0]          # dim // 2

    # Fused Linear + LayerNorm + transpose in Pallas -> (B, Cout, L).
    y = expand_norm_transposed(x, w_linear.T, gamma, beta,
                               compute_dtype=compute_dtype, out_dtype=out_dtype)

    # 2x nearest-neighbor upsample as ONE broadcast+reshape pass (exact match of
    # F.interpolate 'nearest' for integer scale).  Single materialization of the
    # 4x tensor instead of two sequential jnp.repeat passes.
    # TODO(synk): the interleaved (stride-2) HBM write pattern of the upsample is
    # not cleanly expressible as a dense Pallas store, so this pass stays in XLA.
    s = upsample_scale
    y = y.reshape(B, Cout, H, 1, W, 1)
    y = jnp.broadcast_to(y, (B, Cout, H, s, W, s))
    return y.reshape(B, Cout, H * s, W * s)


if __name__ == "__main__":
    key = jax.random.PRNGKey(0)
    B, dim, H, W = 2, 32, 8, 8
    scale = 2
    k1, k2, k3, k4 = jax.random.split(key, 4)

    # Deterministic synthetic parameters (shapes from __init__):
    #   nn.Linear(dim, dim//2, bias=False).weight : (dim//2, dim), y = x @ weight.T
    #   nn.LayerNorm(dim//2).weight / .bias       : (dim//2,)
    x = jax.random.normal(k1, (B, H * W, dim), dtype=jnp.float32)
    w_linear = jax.random.normal(k2, (dim // 2, dim), dtype=jnp.float32) * 0.02
    gamma = 1.0 + 0.1 * jax.random.normal(k3, (dim // 2,), dtype=jnp.float32)
    beta = 0.1 * jax.random.normal(k4, (dim // 2,), dtype=jnp.float32)

    fwd = jax.jit(functools.partial(patch_expand_forward,
                                    input_resolution=(H, W),
                                    upsample_scale=scale))
    out = jax.block_until_ready(fwd(x, w_linear, gamma, beta))

    # Pure-JAX f32 reference of the PyTorch module.
    y_ref = x @ w_linear.T
    mean = y_ref.mean(-1, keepdims=True)
    var = ((y_ref - mean) ** 2).mean(-1, keepdims=True)
    y_ref = (y_ref - mean) / jnp.sqrt(var + LN_EPS) * gamma + beta
    y_ref = y_ref.transpose(0, 2, 1).reshape(B, dim // 2, H, W)
    y_ref = jnp.repeat(jnp.repeat(y_ref, scale, axis=2), scale, axis=3)

    assert out.shape == (B, dim // 2, H * scale, W * scale), out.shape
    err = float(jnp.max(jnp.abs(out - y_ref)))
    # bf16 MXU operands -> tolerance covers bf16 input rounding; LN math is f32.
    assert err < 3e-2, err
    print("KERNEL_OK")
</pallas_src>

<mosaic_0001>
module attributes {stable_mosaic.version = 11 : i64} {
  func.func @_expand_norm_t_kernel(%arg0: i32, %arg1: i32, %arg2: memref<1x64x32xbf16, #tpu.memory_space<vmem>>, %arg3: memref<32x16xbf16, #tpu.memory_space<vmem>>, %arg4: memref<1x16xf32, #tpu.memory_space<vmem>>, %arg5: memref<1x16xf32, #tpu.memory_space<vmem>>, %arg6: memref<1x16x64xf32, #tpu.memory_space<vmem>>) attributes {dimension_semantics = [#tpu.dimension_semantics<parallel>, #tpu.dimension_semantics<parallel>], iteration_bounds = array<i64: 2, 1>, scalar_prefetch = 0 : i64, scratch_operands = 0 : i64, tpu.core_type = #tpu.core_type<tc>, window_params = [{transform_indices = @transform_0, window_bounds = array<i64: 1, 64, 32>}, {pipeline_mode = #tpu.pipeline_mode<synchronous>, transform_indices = @transform_1, window_bounds = array<i64: 32, 16>}, {pipeline_mode = #tpu.pipeline_mode<synchronous>, transform_indices = @transform_2, window_bounds = array<i64: 1, 16>}, {pipeline_mode = #tpu.pipeline_mode<synchronous>, transform_indices = @transform_3, window_bounds = array<i64: 1, 16>}, {transform_indices = @transform_4, window_bounds = array<i64: 1, 16, 64>}]} {
    %c0 = arith.constant 0 : index
    %c0_0 = arith.constant 0 : index
    %c0_1 = arith.constant 0 : index
    %0 = vector.load %arg2[%c0, %c0_0, %c0_1] : memref<1x64x32xbf16, #tpu.memory_space<vmem>>, vector<1x64x32xbf16>
    %1 = vector.shape_cast %0 : vector<1x64x32xbf16> to vector<64x32xbf16>
    %c0_2 = arith.constant 0 : index
    %c0_3 = arith.constant 0 : index
    %2 = vector.load %arg3[%c0_2, %c0_3] : memref<32x16xbf16, #tpu.memory_space<vmem>>, vector<32x16xbf16>
    %cst = arith.constant dense<0.000000e+00> : vector<64x16xf32>
    %3 = tpu.matmul %1, %2, %cst {dimension_numbers = #tpu.dot_dimension_numbers<[1], [0], [0], [1], [0, 0, 1, 1], [], []>} : vector<64x32xbf16>, vector<32x16xbf16>, vector<64x16xf32> -> vector<64x16xf32>
    %cst_4 = arith.constant dense<0.000000e+00> : vector<64xf32>
    %4 = vector.multi_reduction <add>, %3, %cst_4 [1] : vector<64x16xf32> to vector<64xf32>
    %5 = vector.shape_cast %4 : vector<64xf32> to vector<64x1xf32>
    %cst_5 = arith.constant 6.250000e-02 : f32
    %6 = vector.broadcast %cst_5 : f32 to vector<64x1xf32>
    %7 = arith.mulf %5, %6 : vector<64x1xf32>
    %8 = arith.mulf %3, %3 : vector<64x16xf32>
    %cst_6 = arith.constant dense<0.000000e+00> : vector<64xf32>
    %9 = vector.multi_reduction <add>, %8, %cst_6 [1] : vector<64x16xf32> to vector<64xf32>
    %10 = vector.shape_cast %9 : vector<64xf32> to vector<64x1xf32>
    %cst_7 = arith.constant 6.250000e-02 : f32
    %11 = vector.broadcast %cst_7 : f32 to vector<64x1xf32>
    %12 = arith.mulf %10, %11 : vector<64x1xf32>
    %13 = arith.mulf %7, %7 : vector<64x1xf32>
    %14 = arith.subf %12, %13 : vector<64x1xf32>
    %cst_8 = arith.constant 9.99999974E-6 : f32
    %15 = vector.broadcast %cst_8 : f32 to vector<64x1xf32>
    %16 = arith.addf %14, %15 : vector<64x1xf32>
    %17 = math.rsqrt %16 : vector<64x1xf32>
    %c0_9 = arith.constant 0 : index
    %c0_10 = arith.constant 0 : index
    %18 = vector.load %arg4[%c0_9, %c0_10] : memref<1x16xf32, #tpu.memory_space<vmem>>, vector<1x16xf32>
    %19 = vector.broadcast %17 : vector<64x1xf32> to vector<64x16xf32>
    %20 = vector.broadcast %18 : vector<1x16xf32> to vector<64x16xf32>
    %21 = arith.mulf %19, %20 : vector<64x16xf32>
    %22 = vector.broadcast %7 : vector<64x1xf32> to vector<64x16xf32>
    %23 = arith.subf %3, %22 : vector<64x16xf32>
    %24 = arith.mulf %23, %21 : vector<64x16xf32>
    %c0_11 = arith.constant 0 : index
    %c0_12 = arith.constant 0 : index
    %25 = vector.load %arg5[%c0_11, %c0_12] : memref<1x16xf32, #tpu.memory_space<vmem>>, vector<1x16xf32>
    %26 = vector.broadcast %25 : vector<1x16xf32> to vector<64x16xf32>
    %27 = arith.addf %24, %26 : vector<64x16xf32>
    %28 = tpu.transpose %27, [1, 0] : vector<64x16xf32> -> vector<16x64xf32>
    %c0_13 = arith.constant 0 : index
    %c0_14 = arith.constant 0 : index
    %c0_15 = arith.constant 0 : index
    %29 = vector.load %arg6[%c0_13, %c0_14, %c0_15] : memref<1x16x64xf32, #tpu.memory_space<vmem>>, vector<1x16x64xf32>
    %30 = vector.shape_cast %29 : vector<1x16x64xf32> to vector<16x64xf32>
    %31 = vector.shape_cast %28 : vector<16x64xf32> to vector<1x16x64xf32>
    tpu.vector_store %arg6[%c0_13, %c0_14, %c0_15], %31 {strides = array<i32>} : memref<1x16x64xf32, #tpu.memory_space<vmem>>, vector<1x16x64xf32>,
    return
  }
  func.func @transform_0(%arg0: i32, %arg1: i32) -> (i32, i32, i32) {
    %c0_i32 = arith.constant 0 : i32
    %c0_i32_0 = arith.constant 0 : i32
    return %arg0, %arg1, %c0_i32 : i32, i32, i32
  }
  func.func @transform_1(%arg0: i32, %arg1: i32) -> (i32, i32) {
    %c0_i32 = arith.constant 0 : i32
    %c0_i32_0 = arith.constant 0 : i32
    %c0_i32_1 = arith.constant 0 : i32
    return %c0_i32, %c0_i32_0 : i32, i32
  }
  func.func @transform_2(%arg0: i32, %arg1: i32) -> (i32, i32) {
    %c0_i32 = arith.constant 0 : i32
    %c0_i32_0 = arith.constant 0 : i32
    %c0_i32_1 = arith.constant 0 : i32
    return %c0_i32, %c0_i32_0 : i32, i32
  }
  func.func @transform_3(%arg0: i32, %arg1: i32) -> (i32, i32) {
    %c0_i32 = arith.constant 0 : i32
    %c0_i32_0 = arith.constant 0 : i32
    %c0_i32_1 = arith.constant 0 : i32
    return %c0_i32, %c0_i32_0 : i32, i32
  }
  func.func @transform_4(%arg0: i32, %arg1: i32) -> (i32, i32, i32) {
    %c0_i32 = arith.constant 0 : i32
    %c0_i32_0 = arith.constant 0 : i32
    return %arg0, %c0_i32, %arg1 : i32, i32, i32
  }
}

</mosaic_0001>

<bundles_post_ra>
// kernel: patch_expand_forward.1
= control target key start
LH: loop header
LB: loop body
LE: loop exit
PB: predicated region body
PF: predicated region fallthrough
CT: control target
= control target key end

     0   :  { %s769_s15 = smov 0   ;;  %s771_s16 = smov 0   ;;  %s907_s0 = inlined_call_operand.vmem [shape: bf16[2,64,32], index: 0, kind: input, shape index: {}]   ;;  %s908_s1 = inlined_call_operand.vmem [shape: bf16[32,16], index: 1, kind: input, shape index: {}]   ;;  %s909_s2 = inlined_call_operand.vmem [shape: f32[1,16], index: 2, kind: input, shape index: {}]   ;;  %s910_s3 = inlined_call_operand.vmem [shape: f32[1,16], index: 3, kind: input, shape index: {}]   ;;  %s911_s4 = inlined_call_operand.vmem [shape: f32[2,16,64], index: 4, kind: output, shape index: {}]  }
   0x1   :  { %s773_s17 = smov 0  }
   0x2 LB: > { %s26_s18 = sadd.s32 1, %s738_s16  ;;  %p630_p0 = scmp.ge.s32.totalorder %s742_s17, 1  ;;  %s742_s17 = sphi %s773_s17, %s14_s17   ;;  %s738_s16 = sphi %s771_s16, %s913_s16   ;;  %s734_s15 = sphi %s769_s15, %s912_s15  }
   0x3   : > { %p28_p1 = scmp.ge.s32.totalorder %s26_s18, 2  ;;  %p183_p2 = scmp.lt.s32.totalorder %s742_s17, 3 }
   0x5   : > { %s915_s18 = smov (%p28_p1, %s26_s18), 0  ;;  %p184_p3 = pnand %p630_p0, %p183_p2 }
   0x6   : > { %p217_p4 = scmp.lt.s32.totalorder (!%p184_p3), %s734_s15, 1 }
   0x7   : > { %187 = sbr.rel (%p184_p3) target bundleno = 523 (0x20b), region = 36 }
   0xc   : > { %v698_v0 = vld [vmem:[%s908_s1 + $0x8] sm:$0xff]   ;;  %v699_v1 = vld [vmem:[%s908_s1] sm:$0xff]   ;;  %s917_s15 = smov (!%p217_p4, %s734_s15), 1  ;;  %vm279_vm0 = vcmask 261120   ;;  %vm357_vm1 = vcmask 130048   ;;  %vm540_vm2 = vcmask 523264  }
   0xd   : > { %657 = vmatprep.subr.bf16.mxu0 %v698_v0  ;;  %669 = vmatprep.subr.bf16.mxu1 %v698_v0  ;;  %s649_s23 = sshll.u32 %s917_s15, 5  ;;  %s650_s5 = sshll.u32 %s917_s15, 4 }
   0xe   : > { %658 = vmatpush3.bf16.msra.mxu0 %v698_v0  ;;  %671 = vmatpush3.bf16.msra.mxu1 %v698_v0  ;;  %s224_s26 = scalar_lea.vmem %s907_s0, %s649_s23  ;;  %s233_s8 = scalar_lea.vmem %s911_s4, %s650_s5 }
   0xf   : > { %659 = vmatprep.subr.bf16.mxu0 %v699_v1  ;;  %670 = vmatprep.subr.bf16.mxu1 %v699_v1  ;;  %v700_v2 = vld [vmem:[%s224_s26] sm:$0xff]   ;;  %v701_v3 = vld [vmem:[%s224_s26 + $0x8] sm:$0xff]   ;;  %v702_v4 = vld [vmem:[%s224_s26 + $0x10] sm:$0xff]  }
  0x10   : > { %661 = vmatprep.mubr.msk.bf16.mxu0 %vm279_vm0, %v700_v2  ;;  %v703_v5 = vld [vmem:[%s224_s26 + $0x18] sm:$0xff]   ;;  %665 = vmatprep.mubr.msk.bf16.mxu1 %vm279_vm0, %v702_v4 }
  0x12   : > { %660 = vmatpush3.bf16.msra.mxu0 %v699_v1  ;;  %672 = vmatpush3.bf16.msra.mxu1 %v699_v1 }
  0x15   : > { %662 = vmatmul.mubr.msk.bf16.vlgmr.msra.gmra.mxu0 %vm279_vm0, %v701_v3  ;;  %666 = vmatmul.mubr.msk.bf16.vlgmr.msra.gmra.mxu1 %vm279_vm0, %v703_v5 }
  0xd5   : > { %v799_v6 = vpop.f32.mrf.mxu0  ;;  %v801_v7 = vpop.f32.mrf.mxu1 }
  0xd6   : > { %v364_v8 = vsel %vm357_vm1, %v799_v6, 0.0  ;;  %v392_v12 = vmul.f32 %v799_v6, %v799_v6  ;;  %v376_v29 = vsel %vm357_vm1, %v801_v7, 0.0  ;;  %v396_v35 = vmul.f32 %v801_v7, %v801_v7 }
  0xd7   : > { %365 = vadd.xlane.f32.xlu1 %v364_v8  ;;  %v805_v9 = vpop.f32.mrf.mxu0  ;;  %v807_v10 = vpop.f32.mrf.mxu1 }
  0xd8   : > { %v358_v11 = vsel %vm357_vm1, %v805_v9, 0.0  ;;  %v370_v14 = vsel %vm357_vm1, %v807_v10, 0.0  ;;  %v390_v15 = vmul.f32 %v805_v9, %v805_v9  ;;  %v404_v16 = vsel %vm357_vm1, %v392_v12, 0.0 }
  0xd9   : > { %359 = vadd.xlane.f32.xlu0 %v358_v11  ;;  %v813_v13 = vpop.f32.mrf.mxu0  ;;  %v823_v19 = vpop.f32.mrf.mxu1  ;;  %v394_v28 = vmul.f32 %v807_v10, %v807_v10  ;;  %v416_v37 = vsel %vm357_vm1, %v396_v35, 0.0 }
  0xda   : > { %v398_v18 = vsel %vm357_vm1, %v390_v15, 0.0  ;;  %v393_v21 = vmul.f32 %v813_v13, %v813_v13  ;;  %v367_v22 = vsel %vm357_vm1, %v813_v13, 0.0  ;;  %v379_v32 = vsel %vm357_vm1, %v823_v19, 0.0 }
  0xdb   : > { %371 = vadd.xlane.f32.xlu1 %v370_v14  ;;  %v820_v17 = vpop.f32.mrf.mxu0  ;;  %v831_v23 = vpop.f32.mrf.mxu1  ;;  %v410_v31 = vsel %vm357_vm1, %v394_v28, 0.0  ;;  %v397_v33 = vmul.f32 %v823_v19, %v823_v19 }
  0xdc   : > { %v361_v20 = vsel %vm357_vm1, %v820_v17, 0.0  ;;  %v391_v24 = vmul.f32 %v820_v17, %v820_v17  ;;  %v407_v25 = vsel %vm357_vm1, %v393_v21, 0.0  ;;  %v373_v26 = vsel %vm357_vm1, %v831_v23, 0.0 }
  0xdd   : > { %405 = vadd.xlane.f32.xlu0 %v404_v16  ;;  %v395_v30 = vmul.f32 %v831_v23, %v831_v23  ;;  %v419_v36 = vsel %vm357_vm1, %v397_v33, 0.0 }
  0xde   : > { %v401_v27 = vsel %vm357_vm1, %v391_v24, 0.0 }
  0xdf   : > { %399 = vadd.xlane.f32.xlu1 %v398_v18  ;;  %v413_v34 = vsel %vm357_vm1, %v395_v30, 0.0 }
  0xe1   : > { %362 = vadd.xlane.f32.xlu0 %v361_v20 }
  0xe3   : > { %368 = vadd.xlane.f32.xlu1 %v367_v22 }
  0xe5   : > { %408 = vadd.xlane.f32.xlu0 %v407_v25 }
  0xe7   : > { %374 = vadd.xlane.f32.xlu1 %v373_v26 }
  0xe9   : > { %402 = vadd.xlane.f32.xlu0 %v401_v27  ;;  %v645_v27 = vld [vmem:[%s909_s2] ss:$0 sm:$0xff] }
  0xeb   : > { %377 = vadd.xlane.f32.xlu1 %v376_v29 }
  0xed   : > { %411 = vadd.xlane.f32.xlu0 %v410_v31 }
  0xef   : > { %380 = vadd.xlane.f32.xlu1 %v379_v32 }
  0xf1   : > { %414 = vadd.xlane.f32.xlu0 %v413_v34 }
  0xf3   : > { %420 = vadd.xlane.f32.xlu1 %v419_v36 }
  0xf5   : > { %417 = vadd.xlane.f32.xlu0 %v416_v37 }
 0x160   : > { %v366_v38 = vpop.xlane.xlu1 %365 }
 0x161   : > { %v855_v43 = vmul.f32 0.0625, %v366_v38  ;;  %v646_v38 = vld [vmem:[%s910_s3] ss:$0 sm:$0xff] }
 0x162   : > { %v360_v39 = vpop.xlane.xlu0 %359 }
 0x163   : > { %v382_v41 = vmul.f32 0.0625, %v360_v39  ;;  %v432_v50 = vmul.f32 %v855_v43, %v855_v43 }
 0x164   : > { %v372_v40 = vpop.xlane.xlu1 %371 }
 0x165   : > { %v430_v45 = vmul.f32 %v382_v41, %v382_v41  ;;  %v863_v1 = vmul.f32 0.0625, %v372_v40  ;;  %v477_v28 = vsub.f32 %v805_v9, %v382_v41 }
 0x166   : > { %v406_v42 = vpop.xlane.xlu0 %405 }
 0x167   : > { %v424_v47 = vmul.f32 0.0625, %v406_v42  ;;  %v434_v4 = vmul.f32 %v863_v1, %v863_v1 }
 0x168   : > { %v400_v44 = vpop.xlane.xlu1 %399 }
 0x169   : > { %v422_v46 = vmul.f32 0.0625, %v400_v44  ;;  %v440_v53 = vsub.f32 %v424_v47, %v432_v50 }
 0x16a   : > { %v363_v48 = vpop.xlane.xlu0 %362 }
 0x16b   : > { %v438_v49 = vsub.f32 %v422_v46, %v430_v45  ;;  %v383_v56 = vmul.f32 0.0625, %v363_v48  ;;  %v448_v60 = vadd.f32 1e-05, %v440_v53 }
 0x16c   : > { %v369_v51 = vpop.xlane.xlu1 %368 }
 0x16d   : > { %v446_v52 = vadd.f32 1e-05, %v438_v49  ;;  %v859_v54 = vmul.f32 0.0625, %v369_v51  ;;  %v431_v62 = vmul.f32 %v383_v56, %v383_v56  ;;  %v478_v46 = vsub.f32 %v820_v17, %v383_v56 }
 0x16e   : > { %v409_v55 = vpop.xlane.xlu0 %408  ;;  %v479_v51 = vsub.f32 %v799_v6, %v855_v43 }
 0x16f   : > { %704 = vrsqrt.f32 %v446_v52  ;;  %v425_v57 = vmul.f32 0.0625, %v409_v55  ;;  %v433_v58 = vmul.f32 %v859_v54, %v859_v54 }
 0x170   : > { %v375_v59 = vpop.xlane.xlu1 %374  ;;  %706 = vrsqrt.f32 %v448_v60 }
 0x171   : > { %v441_v63 = vsub.f32 %v425_v57, %v433_v58  ;;  %v867_v11 = vmul.f32 0.0625, %v375_v59  ;;  %v480_v59 = vsub.f32 %v813_v13, %v859_v54 }
 0x172   : > { %v403_v61 = vpop.xlane.xlu0 %402 }
 0x173   : > { %v423_v0 = vmul.f32 0.0625, %v403_v61  ;;  %v449_v8 = vadd.f32 1e-05, %v441_v63  ;;  %v435_v21 = vmul.f32 %v867_v11, %v867_v11 }
 0x174   : > { %v378_v2 = vpop.xlane.xlu1 %377 }
 0x175   : > { %v439_v3 = vsub.f32 %v423_v0, %v431_v62  ;;  %v869_v18 = vmul.f32 0.0625, %v378_v2  ;;  %v481_v62 = vsub.f32 %v807_v10, %v863_v1  ;;  %v482_v2 = vsub.f32 %v831_v23, %v867_v11 }
 0x176   : > { %v412_v5 = vpop.xlane.xlu0 %411 }
 0x177   : > { %v447_v12 = vadd.f32 1e-05, %v439_v3  ;;  %v426_v14 = vmul.f32 0.0625, %v412_v5  ;;  %v436_v32 = vmul.f32 %v869_v18, %v869_v18  ;;  %v483_v5 = vsub.f32 %v801_v7, %v869_v18 }
 0x178   : > { %v381_v15 = vpop.xlane.xlu1 %380 }
 0x179   : > { %708 = vrsqrt.f32 %v447_v12  ;;  %v442_v16 = vsub.f32 %v426_v14, %v434_v4  ;;  %v389_v29 = vmul.f32 0.0625, %v381_v15 }
 0x17a   : > { %v415_v20 = vpop.xlane.xlu0 %414  ;;  %710 = vrsqrt.f32 %v449_v8 }
 0x17b   : > { %v450_v22 = vadd.f32 1e-05, %v442_v16  ;;  %v427_v24 = vmul.f32 0.0625, %v415_v20  ;;  %v437_v39 = vmul.f32 %v389_v29, %v389_v29  ;;  %v484_v12 = vsub.f32 %v823_v19, %v389_v29 }
 0x17c   : > { %v705_v25 = vpop.eup %704  ;;  %v421_v26 = vpop.xlane.xlu1 %420 }
 0x17d   : > { %v443_v30 = vsub.f32 %v427_v24, %v435_v21  ;;  %v469_v31 = vmul.f32 %v705_v25, %v645_v27  ;;  %712 = vrsqrt.f32 %v450_v22  ;;  %v429_v35 = vmul.f32 0.0625, %v421_v26  ;;  %v707_v9 = vpop.eup %706 }
 0x17e   : > { %v418_v33 = vpop.xlane.xlu0 %417  ;;  %v471_v49 = vmul.f32 %v707_v9, %v645_v27 }
 0x17f   : > { %v451_v34 = vadd.f32 1e-05, %v443_v30  ;;  %v428_v36 = vmul.f32 0.0625, %v418_v33  ;;  %v485_v37 = vmul.f32 %v477_v28, %v469_v31  ;;  %v445_v41 = vsub.f32 %v429_v35, %v437_v39 }
 0x180   : > { %v487_v57 = vmul.f32 %v479_v51, %v471_v49 }
 0x181   : > { %v444_v40 = vsub.f32 %v428_v36, %v436_v32  ;;  %v500_v42 = vadd.f32 %v646_v38, %v485_v37  ;;  %714 = vrsqrt.f32 %v451_v34  ;;  %v453_v47 = vadd.f32 1e-05, %v445_v41 }
 0x182   : > { %v502_v60 = vadd.f32 %v646_v38, %v487_v57 }
 0x183   : > { %v452_v44 = vadd.f32 1e-05, %v444_v40  ;;  %508 = vxpose.xlu0.b32.start [1/8] (short) (narrow) %v500_v42, 16 }
 0x185   : > { %716 = vrsqrt.f32 %v452_v44 }
 0x186   : > { %v709_v45 = vpop.eup %708  ;;  %718 = vrsqrt.f32 %v453_v47 }
 0x187   : > { %v470_v48 = vmul.f32 %v709_v45, %v645_v27  ;;  %v711_v50 = vpop.eup %710 }
 0x188   : > { %v472_v58 = vmul.f32 %v711_v50, %v645_v27 }
 0x189   : > { %v486_v52 = vmul.f32 %v478_v46, %v470_v48 }
 0x18a   : > { %v713_v53 = vpop.eup %712  ;;  %v488_v17 = vmul.f32 %v480_v59, %v472_v58 }
 0x18b   : > { %v501_v55 = vadd.f32 %v646_v38, %v486_v52  ;;  %v473_v56 = vmul.f32 %v713_v53, %v645_v27 }
 0x18c   : > { %v503_v63 = vadd.f32 %v646_v38, %v488_v17 }
 0x18d   : > { %509 = vxpose.xlu0.b32.cont [2/8] (short) (narrow) %v501_v55, 16  ;;  %v489_v6 = vmul.f32 %v481_v62, %v473_v56 }
 0x18e   : > { %v715_v61 = vpop.eup %714 }
 0x18f   : > { %v474_v43 = vmul.f32 %v715_v61, %v645_v27  ;;  %v504_v3 = vadd.f32 %v646_v38, %v489_v6 }
 0x191   : > { %510 = vxpose.xlu0.b32.cont [3/8] (short) (narrow) %v502_v60, 16  ;;  %v490_v13 = vmul.f32 %v482_v2, %v474_v43 }
 0x192   : > { %v717_v0 = vpop.eup %716 }
 0x193   : > { %v475_v54 = vmul.f32 %v717_v0, %v645_v27  ;;  %v719_v4 = vpop.eup %718  ;;  %v505_v8 = vadd.f32 %v646_v38, %v490_v13 }
 0x194   : > { %v476_v1 = vmul.f32 %v719_v4, %v645_v27 }
 0x195   : > { %511 = vxpose.xlu0.b32.cont [4/8] (short) (narrow) %v503_v63, 16  ;;  %v491_v10 = vmul.f32 %v483_v5, %v475_v54 }
 0x196   : > { %v492_v15 = vmul.f32 %v484_v12, %v476_v1 }
 0x197   : > { %v506_v14 = vadd.f32 %v646_v38, %v491_v10 }
 0x198   : > { %v507_v23 = vadd.f32 %v646_v38, %v492_v15 }
 0x199   : > { %512 = vxpose.xlu0.b32.cont [5/8] (short) (narrow) %v504_v3, 16 }
 0x19d   : > { %513 = vxpose.xlu0.b32.cont [6/8] (short) (narrow) %v505_v8, 16 }
 0x1a1   : > { %514 = vxpose.xlu0.b32.cont [7/8] (short) (narrow) %v506_v14, 16 }
 0x1a5   : > { %515 = vxpose.xlu0.b32.end [8/8] (short) (narrow) %v507_v23, 16 }
 0x205   : > { %v524_v11 = vpop.trf.xlu0 }
 0x206   : > { %541 = vst.msk [vmem:[%s233_s8] sm:$0xff] %vm540_vm2, %v524_v11 }
 0x209   : > { %v525_v7 = vpop.trf.xlu0 }
 0x20a   : > { %542 = vst.msk [vmem:[%s233_s8 + $0x8] sm:$0xff] %vm540_vm2, %v525_v7 }
 0x20b PF: > { %s14_s17 = sadd.s32 1, %s742_s17   ;;  %s912_s15 = smov %s738_s16 }
 0x20c   : > { %p11_p5 = scmp.ge.s32.totalorder %s14_s17, 4   ;;  %s913_s16 = smov %s915_s18 }
 0x20e   :  { %13 = sbr.rel (!%p11_p5) target bundleno = 2 (0x2), region = 66 }

</bundles_post_ra>
